<compile_context>
chip_gen: v6e
topology: v6e:2x2x1
jax: 0.10.0
libtpu: 0.0.40
codegen_flags: <defaults>
</compile_context>

<pallas_src>
import jax
import jax.numpy as jnp
from jax.experimental import pallas as pl
from jax.experimental.pallas import tpu as pltpu

CPAD = 8  # sublane padding for class / feature-map channel dims (F, C <= 8)


# ----------------------------------------------------------------------------
# Fused multi-stage TCN kernel (all stages, all layers, both softmaxes)
# ----------------------------------------------------------------------------

def _make_mstcn_kernel(num_stages, num_layers, num_classes, t_pad, max_length,
                       wcols):
    def kernel(video_ref, valid_ref, lane_ref, w_ref, b_ref,
               outs_ref, pred_ref):
        valid = valid_ref[...]                       # (1, N) f32 {0,1}
        lane = lane_ref[...]                         # (1, N) int32 lane-local t
        n_total = valid.shape[1]
        row = jax.lax.broadcasted_iota(jnp.int32, (CPAD, 1), 0)
        ch_ok = row < num_classes                    # real class rows

        stage_in = video_ref[...] * valid            # zero per-video padding
        logits = None
        idx = 0
        for s in range(num_stages):
            w_in = w_ref[idx][:, :wcols[idx]]
            act = jnp.dot(w_in, stage_in,
                          preferred_element_type=jnp.float32) + b_ref[idx]
            idx += 1
            for l in range(num_layers):
                d = 2 ** l                           # dilation
                a = act * valid                      # == per-video zero pad
                left = jnp.where(lane >= d,
                                 pltpu.roll(a, shift=d, axis=1), 0.0)
                right = jnp.where(lane < t_pad - d,
                                  pltpu.roll(a, shift=n_total - d, axis=1),
                                  0.0)
                x3 = jnp.concatenate([left, a, right], axis=0)   # (3*CPAD, N)
                wd = w_ref[idx][:, :wcols[idx]]       # fused 3-tap weights
                conv = jnp.dot(wd, x3,
                               preferred_element_type=jnp.float32) + b_ref[idx]
                idx += 1
                y = jnp.maximum(conv, 0.0)            # ReLU
                w1 = w_ref[idx][:, :wcols[idx]]
                out = jnp.dot(w1, y,
                              preferred_element_type=jnp.float32) + b_ref[idx]
                idx += 1
                act = a + out                         # residual (dropout = id)
            w_out = w_ref[idx][:, :wcols[idx]]
            logits = jnp.dot(w_out, act,
                             preferred_element_type=jnp.float32) + b_ref[idx]
            idx += 1
            outs_ref[s] = logits
            if s + 1 < num_stages:
                # F.softmax(out, dim=1): channel softmax, real rows only.
                ml = jnp.where(ch_ok, logits, -1e30)
                m = jnp.max(ml, axis=0, keepdims=True)
                e = jnp.exp(ml - m)
                stage_in = e / jnp.sum(e, axis=0, keepdims=True)

        # hybrid_model: zero-pad last-stage logits to max_length and softmax
        # over the time axis of the padded (C, max_length) tensor, per video.
        in_win = lane < max_length
        pred = jnp.where(in_win, logits * valid, -1e30)
        n_vid = n_total // t_pad
        for b in range(n_vid):                        # tiny static loop
            lo = b * t_pad
            seg = pred[:, lo:lo + t_pad]
            m = jnp.max(seg, axis=1, keepdims=True)
            e = jnp.exp(seg - m)
            pred_ref[:, lo:lo + t_pad] = e / jnp.sum(e, axis=1, keepdims=True)

    return kernel


def _pad2(m, rows, cols):
    return jnp.pad(m, ((0, rows - m.shape[0]), (0, cols - m.shape[1])))


def fused_mstcn(videos_cat, valid, lane_local, mstcn_params, t_pad, max_length):
    """videos_cat: (dim, B*t_pad); valid/lane_local: (1, B*t_pad)."""
    dim, n_total = videos_cat.shape
    num_stages = len(mstcn_params)
    num_layers = len(mstcn_params[0]["layers"])
    num_classes = mstcn_params[0]["w_out"].shape[0]

    mats, biases, wcols = [], [], []

    def add(w, b, cols):
        mats.append(_pad2(w, CPAD, 128))
        biases.append(jnp.pad(b, (0, CPAD - b.shape[0])).reshape(CPAD, 1))
        wcols.append(cols)

    for s, sp in enumerate(mstcn_params):
        add(sp["w_in"], sp["b_in"], dim if s == 0 else CPAD)
        for lp in sp["layers"]:
            wd = lp["wd"]                              # (3, F, F) taps
            taps = [_pad2(wd[k], CPAD, CPAD) for k in range(3)]
            add(jnp.concatenate(taps, axis=1), lp["bd"], 3 * CPAD)
            add(lp["w1"], lp["b1"], CPAD)
        add(sp["w_out"], sp["b_out"], CPAD)

    w_pack = jnp.stack(mats)                           # (n, CPAD, 128)
    b_pack = jnp.stack(biases)                         # (n, CPAD, 1)

    kernel = _make_mstcn_kernel(num_stages, num_layers, num_classes,
                                t_pad, max_length, tuple(wcols))

    def full(shape):
        return pl.BlockSpec(shape, lambda i: (0,) * len(shape))

    out_shape = (
        jax.ShapeDtypeStruct((num_stages, CPAD, n_total), jnp.float32),
        jax.ShapeDtypeStruct((CPAD, n_total), jnp.float32),
    )
    stages_out, pred_soft = pl.pallas_call(
        kernel,
        out_shape=out_shape,
        grid=(1,),
        in_specs=[full(videos_cat.shape), full(valid.shape),
                  full(lane_local.shape), full(w_pack.shape),
                  full(b_pack.shape)],
        out_specs=(full(out_shape[0].shape), full(out_shape[1].shape)),
        compiler_params=pltpu.CompilerParams(
            dimension_semantics=("arbitrary",),
            vmem_limit_bytes=32 * 1024 * 1024),
    )(videos_cat, valid, lane_local, w_pack, b_pack)
    return stages_out, pred_soft


# ----------------------------------------------------------------------------
# Fused RNN kernel (2-layer LSTM + Linear head), all sequences in one step
# ----------------------------------------------------------------------------

def _make_rnn_kernel(bsz, t_out, hidden, num_layers, offsets, layer_idx,
                     i_wh, i_bh):
    def kernel(x_ref, len_ref, w_ref, out_ref, gx_ref, hseq_ref):
        lens = len_ref[...]                            # (B, 1) int32

        def wslice(i):
            off, r = offsets[i]
            return w_ref[off:off + r, :]               # (r, 4H)

        for l in range(num_layers):
            i_ih, i_hh, i_b = layer_idx[l]
            wih = wslice(i_ih)
            whh = wslice(i_hh)
            bias = wslice(i_b)                         # (1, 4H)
            # Hoisted input projection: one (T*B, Din) @ (Din, 4H) matmul.
            src = x_ref[...] if l == 0 else hseq_ref[...]
            gx_ref[...] = jnp.dot(src, wih,
                                  preferred_element_type=jnp.float32) + bias
            pad_val = -1.0 if l == num_layers - 1 else 0.0   # pad_packed=-1
            h = jnp.zeros((bsz, hidden), jnp.float32)
            c = jnp.zeros((bsz, hidden), jnp.float32)
            # T is small & static here; the serial chain only carries h@Whh.
            # TODO(synk): switch to lax.fori_loop + dynamic pl.ds row reads
            #             for long sequences.
            for t in range(t_out):
                gates = gx_ref[t * bsz:(t + 1) * bsz, :] + jnp.dot(
                    h, whh, preferred_element_type=jnp.float32)
                # gate columns pre-ordered (i, f, o, g): one sigmoid, one tanh
                sg = jax.nn.sigmoid(gates[:, :3 * hidden])
                i_g = sg[:, :hidden]
                f_g = sg[:, hidden:2 * hidden]
                o_g = sg[:, 2 * hidden:3 * hidden]
                g_g = jnp.tanh(gates[:, 3 * hidden:])
                c_new = f_g * c + i_g * g_g
                h_new = o_g * jnp.tanh(c_new)
                live = lens > t                        # packed-seq freeze mask
                h = jnp.where(live, h_new, h)
                c = jnp.where(live, c_new, c)
                hseq_ref[t * bsz:(t + 1) * bsz, :] = jnp.where(
                    live, h_new, pad_val)

        # Linear head over all (t, b) rows at once; output lane-dense (4H wide,
        # classes in the first C lanes).
        out_ref[...] = jnp.dot(hseq_ref[...], wslice(i_wh),
                               preferred_element_type=jnp.float32) + wslice(i_bh)

    return kernel


def fused_rnn(x_flat, len_col, rnn_params, bsz, t_out, num_classes, kin_dim,
              din_pad):
    layers = rnn_params["layers"]
    head = rnn_params["heads"][0]
    hidden = layers[0]["whh"].shape[0]
    gdim = 4 * hidden
    num_layers = len(layers)

    # Pack every RNN weight into ONE (rows, 4H) f32 buffer (1 DMA).
    blocks, offsets = [], []

    def add(mat):
        r = mat.shape[0]
        rp = ((r + 7) // 8) * 8
        off = sum(b.shape[0] for b in blocks)
        blocks.append(jnp.pad(mat, ((0, rp - r), (0, 0))))
        offsets.append((off, r))
        return len(offsets) - 1

    layer_idx = []
    for l, lp in enumerate(layers):
        wih = lp["wih"]                                # (d_in, 4H)
        if l == 0:
            # re-embed [pred | kin] rows into the padded feature layout
            w_pad = jnp.zeros((din_pad, gdim), jnp.float32)
            w_pad = w_pad.at[:num_classes].set(wih[:num_classes])
            w_pad = w_pad.at[CPAD:CPAD + kin_dim].set(wih[num_classes:])
            wih = w_pad
        layer_idx.append((add(wih), add(lp["whh"]), add(lp["b"].reshape(1, gdim))))
    wh = jnp.zeros((hidden, gdim), jnp.float32).at[:, :num_classes].set(head["w"].T)
    bh = jnp.zeros((1, gdim), jnp.float32).at[0, :num_classes].set(head["b"])
    i_wh = add(wh)
    i_bh = add(bh)
    w_pack = jnp.concatenate(blocks, axis=0)           # (rows_total, 4H)

    kernel = _make_rnn_kernel(bsz, t_out, hidden, num_layers,
                              tuple(offsets), tuple(layer_idx), i_wh, i_bh)

    def full(shape):
        return pl.BlockSpec(shape, lambda i: (0,) * len(shape))

    out_shape = jax.ShapeDtypeStruct((t_out * bsz, gdim), jnp.float32)
    y = pl.pallas_call(
        kernel,
        out_shape=out_shape,
        grid=(1,),
        in_specs=[full(x_flat.shape), full(len_col.shape), full(w_pack.shape)],
        out_specs=full(out_shape.shape),
        scratch_shapes=[pltpu.VMEM((t_out * bsz, gdim), jnp.float32),
                        pltpu.VMEM((t_out * bsz, hidden), jnp.float32)],
        compiler_params=pltpu.CompilerParams(
            dimension_semantics=("arbitrary",),
            vmem_limit_bytes=32 * 1024 * 1024),
    )(x_flat, len_col, w_pack)
    return y                                           # (T_out*B, 4H)


# ----------------------------------------------------------------------------
# hybrid_model forward (host glue)
# ----------------------------------------------------------------------------

def hybrid_forward(videos_input, kinetic_input, lengths, params):
    bsz = len(videos_input)
    dim = videos_input[0].shape[1]
    num_classes = params["mstcn"][0]["w_out"].shape[0]
    kin_dim = kinetic_input[0].shape[0]

    video_lengths = [int(v.shape[2]) for v in videos_input]
    max_length = max(int(max(lengths)), max(video_lengths))
    t_pad = ((max_length + 127) // 128) * 128          # lane-dense time axis

    # Batch all videos along the lane axis: (dim, B*t_pad)
    videos_cat = jnp.concatenate(
        [jnp.pad(v[0], ((0, 0), (0, t_pad - v.shape[2]))) for v in videos_input],
        axis=1)
    tloc = jnp.arange(t_pad, dtype=jnp.int32)
    vlen = jnp.asarray(video_lengths, jnp.int32)
    valid = (tloc[None, :] < vlen[:, None]).astype(jnp.float32).reshape(
        1, bsz * t_pad)
    lane_local = jnp.broadcast_to(tloc[None, :], (bsz, t_pad)).reshape(
        1, bsz * t_pad)

    stages_out, pred_soft = fused_mstcn(videos_cat, valid, lane_local,
                                        params["mstcn"], t_pad, max_length)

    # Per-video stacked stage logits, shaped (num_stages, 1, C, T_v).
    mctscn_outputs = [
        stages_out[:, :num_classes,
                   i * t_pad:i * t_pad + video_lengths[i]][:, None]
        for i in range(bsz)
    ]

    # RNN input: time-major (T_out*B, Din_pad) with features
    # [pred classes (CPAD) | kinematics | zero pad].
    t_out = int(max(lengths))                          # pad_packed length
    din_pad = ((CPAD + kin_dim + 7) // 8) * 8
    pred_tbc = jnp.transpose(pred_soft.reshape(CPAD, bsz, t_pad),
                             (2, 1, 0))[:t_out]        # (T_out, B, CPAD)
    kin_tbc = jnp.transpose(jnp.stack(kinetic_input), (2, 0, 1))[:t_out]
    pieces = [pred_tbc, kin_tbc]
    extra = din_pad - CPAD - kin_dim
    if extra:
        pieces.append(jnp.zeros((t_out, bsz, extra), jnp.float32))
    x_flat = jnp.concatenate(pieces, axis=-1).reshape(t_out * bsz, din_pad)
    len_col = jnp.asarray(lengths, jnp.int32).reshape(bsz, 1)

    head_out = fused_rnn(x_flat, len_col, params["rnn"], bsz, t_out,
                         num_classes, kin_dim, din_pad)
    final = jnp.transpose(
        head_out[:, :num_classes].reshape(t_out, bsz, num_classes), (1, 2, 0))
    return mctscn_outputs, [final]                     # list of output heads


# ----------------------------------------------------------------------------
# Deterministic parameter initialization
# ----------------------------------------------------------------------------

def init_params(key, num_stages, num_layers, num_f_maps, dim, num_classes,
                rnn_input_dim, rnn_hidden_dim, rnn_num_layers):
    assert num_f_maps <= CPAD and num_classes <= CPAD
    keys = iter(jax.random.split(key, 512))

    def rn(shape, scale=0.1):
        return scale * jax.random.normal(next(keys), shape, jnp.float32)

    def make_stage(in_dim):
        layers = []
        for i in range(num_layers):
            layers.append(dict(
                dilation=2 ** i,
                wd=rn((3, num_f_maps, num_f_maps)),   # conv taps (k, out, in)
                bd=rn((num_f_maps,)),
                w1=rn((num_f_maps, num_f_maps)),
                b1=rn((num_f_maps,)),
            ))
        return dict(
            w_in=rn((num_f_maps, in_dim)), b_in=rn((num_f_maps,)),
            layers=layers,
            w_out=rn((num_classes, num_f_maps)), b_out=rn((num_classes,)),
        )

    mstcn = [make_stage(dim)] + [make_stage(num_classes)
                                 for _ in range(num_stages - 1)]

    rnn_layers = []
    d_in = rnn_input_dim
    for _ in range(rnn_num_layers):
        rnn_layers.append(dict(
            wih=rn((d_in, 4 * rnn_hidden_dim)),   # gate columns in (i,f,o,g)
            whh=rn((rnn_hidden_dim, 4 * rnn_hidden_dim)),
            b=rn((4 * rnn_hidden_dim,)),          # b_ih + b_hh folded together
        ))
        d_in = rnn_hidden_dim

    heads = [dict(w=rn((num_classes, rnn_hidden_dim)), b=rn((num_classes,)))]
    return dict(mstcn=mstcn, rnn=dict(layers=rnn_layers, heads=heads))


# ----------------------------------------------------------------------------
# Main
# ----------------------------------------------------------------------------

if __name__ == "__main__":
    num_stages = 2
    num_layers = 2          # dilated residual layers per stage
    num_f_maps = 8
    dim = 12                # video feature dim
    num_classes = 4
    kin_dim = 6             # kinematics feature dim
    rnn_input_dim = num_classes + kin_dim
    rnn_hidden_dim = 32     # 4*H = 128 -> lane-dense LSTM gates & head output
    rnn_num_layers = 2

    root = jax.random.PRNGKey(0)
    kp, k1, k2, k3, k4 = jax.random.split(root, 5)

    params = init_params(kp, num_stages, num_layers, num_f_maps, dim,
                         num_classes, rnn_input_dim, rnn_hidden_dim,
                         rnn_num_layers)

    # 2 videos of different temporal lengths, 2 kinematics streams of equal
    # (padded) length, valid lengths per sequence.
    videos_input = [
        jax.random.normal(k1, (1, dim, 16), jnp.float32),
        jax.random.normal(k2, (1, dim, 12), jnp.float32),
    ]
    kinetic_input = [
        jax.random.normal(k3, (kin_dim, 16), jnp.float32),
        jax.random.normal(k4, (kin_dim, 16), jnp.float32),
    ]
    lengths = [16, 12]

    mctscn_outputs, final_predictions = hybrid_forward(
        videos_input, kinetic_input, lengths, params)

    jax.block_until_ready(mctscn_outputs)
    jax.block_until_ready(final_predictions)
    print("KERNEL_OK")
</pallas_src>

<mosaic_0001>
module attributes {stable_mosaic.version = 11 : i64} {
  func.func @kernel(%arg0: i32, %arg1: memref<12x256xf32, #tpu.memory_space<vmem>>, %arg2: memref<1x256xf32, #tpu.memory_space<vmem>>, %arg3: memref<1x256xi32, #tpu.memory_space<vmem>>, %arg4: memref<12x8x128xf32, #tpu.memory_space<vmem>>, %arg5: memref<12x8x1xf32, #tpu.memory_space<vmem>>, %arg6: memref<2x8x256xf32, #tpu.memory_space<vmem>>, %arg7: memref<8x256xf32, #tpu.memory_space<vmem>>) attributes {dimension_semantics = [#tpu.dimension_semantics<arbitrary>], iteration_bounds = array<i64: 1>, scalar_prefetch = 0 : i64, scratch_operands = 0 : i64, tpu.core_type = #tpu.core_type<tc>, window_params = [{pipeline_mode = #tpu.pipeline_mode<synchronous>, transform_indices = @transform_0, window_bounds = array<i64: 12, 256>}, {pipeline_mode = #tpu.pipeline_mode<synchronous>, transform_indices = @transform_1, window_bounds = array<i64: 1, 256>}, {pipeline_mode = #tpu.pipeline_mode<synchronous>, transform_indices = @transform_2, window_bounds = array<i64: 1, 256>}, {pipeline_mode = #tpu.pipeline_mode<synchronous>, transform_indices = @transform_3, window_bounds = array<i64: 12, 8, 128>}, {pipeline_mode = #tpu.pipeline_mode<synchronous>, transform_indices = @transform_4, window_bounds = array<i64: 12, 8, 1>}, {pipeline_mode = #tpu.pipeline_mode<synchronous>, transform_indices = @transform_5, window_bounds = array<i64: 2, 8, 256>}, {pipeline_mode = #tpu.pipeline_mode<synchronous>, transform_indices = @transform_6, window_bounds = array<i64: 8, 256>}]} {
    %c0 = arith.constant 0 : index
    %c0_0 = arith.constant 0 : index
    %0 = vector.load %arg2[%c0, %c0_0] : memref<1x256xf32, #tpu.memory_space<vmem>>, vector<1x256xf32>
    %c0_1 = arith.constant 0 : index
    %c0_2 = arith.constant 0 : index
    %1 = vector.load %arg3[%c0_1, %c0_2] : memref<1x256xi32, #tpu.memory_space<vmem>>, vector<1x256xi32>
    %2 = tpu.iota {dimensions = array<i32: 0>} : vector<8x1xi32>
    %c4_i32 = arith.constant 4 : i32
    %3 = vector.broadcast %c4_i32 : i32 to vector<8x1xi32>
    %4 = arith.cmpi slt, %2, %3 : vector<8x1xi32>
    %c0_3 = arith.constant 0 : index
    %c0_4 = arith.constant 0 : index
    %5 = vector.load %arg1[%c0_3, %c0_4] : memref<12x256xf32, #tpu.memory_space<vmem>>, vector<12x256xf32>
    %6 = vector.broadcast %0 : vector<1x256xf32> to vector<12x256xf32>
    %7 = arith.mulf %5, %6 : vector<12x256xf32>
    %c0_5 = arith.constant 0 : index
    %c0_6 = arith.constant 0 : index
    %c0_7 = arith.constant 0 : index
    %8 = vector.load %arg4[%c0_5, %c0_6, %c0_7] : memref<12x8x128xf32, #tpu.memory_space<vmem>>, vector<1x8x128xf32>
    %9 = vector.shape_cast %8 : vector<1x8x128xf32> to vector<8x128xf32>
    %10 = vector.extract_strided_slice %9 {offsets = [0, 0], sizes = [8, 12], strides = [1, 1]} : vector<8x128xf32> to vector<8x12xf32>
    %cst = arith.constant dense<0.000000e+00> : vector<8x256xf32>
    %11 = tpu.matmul %10, %7, %cst {dimension_numbers = #tpu.dot_dimension_numbers<[1], [0], [0], [1], [0, 0, 1, 1], [], []>} : vector<8x12xf32>, vector<12x256xf32>, vector<8x256xf32> -> vector<8x256xf32>
    %c0_8 = arith.constant 0 : index
    %c0_9 = arith.constant 0 : index
    %c0_10 = arith.constant 0 : index
    %12 = vector.load %arg5[%c0_8, %c0_9, %c0_10] : memref<12x8x1xf32, #tpu.memory_space<vmem>>, vector<1x8x1xf32>
    %13 = vector.shape_cast %12 : vector<1x8x1xf32> to vector<8x1xf32>
    %14 = vector.broadcast %13 : vector<8x1xf32> to vector<8x256xf32>
    %15 = arith.addf %11, %14 : vector<8x256xf32>
    %16 = vector.broadcast %0 : vector<1x256xf32> to vector<8x256xf32>
    %17 = arith.mulf %15, %16 : vector<8x256xf32>
    %c1_i32 = arith.constant 1 : i32
    %18 = vector.broadcast %c1_i32 : i32 to vector<1x256xi32>
    %19 = arith.cmpi sge, %1, %18 : vector<1x256xi32>
    %c1_i32_11 = arith.constant 1 : i32
    %20 = tpu.dynamic_rotate %17 by %c1_i32_11 dim 1 : vector<8x256xf32>, i32 -> vector<8x256xf32>
    %cst_12 = arith.constant 0.000000e+00 : f32
    %21 = vector.shape_cast %19 : vector<1x256xi1> to vector<1x256xi1>
    %22 = vector.broadcast %21 : vector<1x256xi1> to vector<8x256xi1>
    %23 = vector.broadcast %cst_12 : f32 to vector<8x256xf32>
    %24 = arith.select %22, %20, %23 : vector<8x256xi1>, vector<8x256xf32>
    %c127_i32 = arith.constant 127 : i32
    %25 = vector.broadcast %c127_i32 : i32 to vector<1x256xi32>
    %26 = arith.cmpi slt, %1, %25 : vector<1x256xi32>
    %c255_i32 = arith.constant 255 : i32
    %27 = tpu.dynamic_rotate %17 by %c255_i32 dim 1 : vector<8x256xf32>, i32 -> vector<8x256xf32>
    %cst_13 = arith.constant 0.000000e+00 : f32
    %28 = vector.shape_cast %26 : vector<1x256xi1> to vector<1x256xi1>
    %29 = vector.broadcast %28 : vector<1x256xi1> to vector<8x256xi1>
    %30 = vector.broadcast %cst_13 : f32 to vector<8x256xf32>
    %31 = arith.select %29, %27, %30 : vector<8x256xi1>, vector<8x256xf32>
    %32 = tpu.concatenate %24, %17, %31 in 0 : vector<8x256xf32>, vector<8x256xf32>, vector<8x256xf32> -> vector<24x256xf32>
    %c1 = arith.constant 1 : index
    %c0_14 = arith.constant 0 : index
    %c0_15 = arith.constant 0 : index
    %33 = vector.load %arg4[%c1, %c0_14, %c0_15] : memref<12x8x128xf32, #tpu.memory_space<vmem>>, vector<1x8x128xf32>
    %34 = vector.shape_cast %33 : vector<1x8x128xf32> to vector<8x128xf32>
    %35 = vector.extract_strided_slice %34 {offsets = [0, 0], sizes = [8, 24], strides = [1, 1]} : vector<8x128xf32> to vector<8x24xf32>
    %cst_16 = arith.constant dense<0.000000e+00> : vector<8x256xf32>
    %36 = tpu.matmul %35, %32, %cst_16 {dimension_numbers = #tpu.dot_dimension_numbers<[1], [0], [0], [1], [0, 0, 1, 1], [], []>} : vector<8x24xf32>, vector<24x256xf32>, vector<8x256xf32> -> vector<8x256xf32>
    %c1_17 = arith.constant 1 : index
    %c0_18 = arith.constant 0 : index
    %c0_19 = arith.constant 0 : index
    %37 = vector.load %arg5[%c1_17, %c0_18, %c0_19] : memref<12x8x1xf32, #tpu.memory_space<vmem>>, vector<1x8x1xf32>
    %38 = vector.shape_cast %37 : vector<1x8x1xf32> to vector<8x1xf32>
    %39 = vector.broadcast %38 : vector<8x1xf32> to vector<8x256xf32>
    %40 = arith.addf %36, %39 : vector<8x256xf32>
    %cst_20 = arith.constant 0.000000e+00 : f32
    %41 = vector.broadcast %cst_20 : f32 to vector<8x256xf32>
    %42 = arith.maximumf %40, %41 : vector<8x256xf32>
    %c2 = arith.constant 2 : index
    %c0_21 = arith.constant 0 : index
    %c0_22 = arith.constant 0 : index
    %43 = vector.load %arg4[%c2, %c0_21, %c0_22] : memref<12x8x128xf32, #tpu.memory_space<vmem>>, vector<1x8x128xf32>
    %44 = vector.shape_cast %43 : vector<1x8x128xf32> to vector<8x128xf32>
    %45 = vector.extract_strided_slice %44 {offsets = [0, 0], sizes = [8, 8], strides = [1, 1]} : vector<8x128xf32> to vector<8x8xf32>
    %cst_23 = arith.constant dense<0.000000e+00> : vector<8x256xf32>
    %46 = tpu.matmul %45, %42, %cst_23 {dimension_numbers = #tpu.dot_dimension_numbers<[1], [0], [0], [1], [0, 0, 1, 1], [], []>} : vector<8x8xf32>, vector<8x256xf32>, vector<8x256xf32> -> vector<8x256xf32>
    %c2_24 = arith.constant 2 : index
    %c0_25 = arith.constant 0 : index
    %c0_26 = arith.constant 0 : index
    %47 = vector.load %arg5[%c2_24, %c0_25, %c0_26] : memref<12x8x1xf32, #tpu.memory_space<vmem>>, vector<1x8x1xf32>
    %48 = vector.shape_cast %47 : vector<1x8x1xf32> to vector<8x1xf32>
    %49 = vector.broadcast %48 : vector<8x1xf32> to vector<8x256xf32>
    %50 = arith.addf %46, %49 : vector<8x256xf32>
    %51 = arith.addf %17, %50 : vector<8x256xf32>
    %52 = vector.broadcast %0 : vector<1x256xf32> to vector<8x256xf32>
    %53 = arith.mulf %51, %52 : vector<8x256xf32>
    %c2_i32 = arith.constant 2 : i32
    %54 = vector.broadcast %c2_i32 : i32 to vector<1x256xi32>
    %55 = arith.cmpi sge, %1, %54 : vector<1x256xi32>
    %c2_i32_27 = arith.constant 2 : i32
    %56 = tpu.dynamic_rotate %53 by %c2_i32_27 dim 1 : vector<8x256xf32>, i32 -> vector<8x256xf32>
    %cst_28 = arith.constant 0.000000e+00 : f32
    %57 = vector.shape_cast %55 : vector<1x256xi1> to vector<1x256xi1>
    %58 = vector.broadcast %57 : vector<1x256xi1> to vector<8x256xi1>
    %59 = vector.broadcast %cst_28 : f32 to vector<8x256xf32>
    %60 = arith.select %58, %56, %59 : vector<8x256xi1>, vector<8x256xf32>
    %c126_i32 = arith.constant 126 : i32
    %61 = vector.broadcast %c126_i32 : i32 to vector<1x256xi32>
    %62 = arith.cmpi slt, %1, %61 : vector<1x256xi32>
    %c254_i32 = arith.constant 254 : i32
    %63 = tpu.dynamic_rotate %53 by %c254_i32 dim 1 : vector<8x256xf32>, i32 -> vector<8x256xf32>
    %cst_29 = arith.constant 0.000000e+00 : f32
    %64 = vector.shape_cast %62 : vector<1x256xi1> to vector<1x256xi1>
    %65 = vector.broadcast %64 : vector<1x256xi1> to vector<8x256xi1>
    %66 = vector.broadcast %cst_29 : f32 to vector<8x256xf32>
    %67 = arith.select %65, %63, %66 : vector<8x256xi1>, vector<8x256xf32>
    %68 = tpu.concatenate %60, %53, %67 in 0 : vector<8x256xf32>, vector<8x256xf32>, vector<8x256xf32> -> vector<24x256xf32>
    %c3 = arith.constant 3 : index
    %c0_30 = arith.constant 0 : index
    %c0_31 = arith.constant 0 : index
    %69 = vector.load %arg4[%c3, %c0_30, %c0_31] : memref<12x8x128xf32, #tpu.memory_space<vmem>>, vector<1x8x128xf32>
    %70 = vector.shape_cast %69 : vector<1x8x128xf32> to vector<8x128xf32>
    %71 = vector.extract_strided_slice %70 {offsets = [0, 0], sizes = [8, 24], strides = [1, 1]} : vector<8x128xf32> to vector<8x24xf32>
    %cst_32 = arith.constant dense<0.000000e+00> : vector<8x256xf32>
    %72 = tpu.matmul %71, %68, %cst_32 {dimension_numbers = #tpu.dot_dimension_numbers<[1], [0], [0], [1], [0, 0, 1, 1], [], []>} : vector<8x24xf32>, vector<24x256xf32>, vector<8x256xf32> -> vector<8x256xf32>
    %c3_33 = arith.constant 3 : index
    %c0_34 = arith.constant 0 : index
    %c0_35 = arith.constant 0 : index
    %73 = vector.load %arg5[%c3_33, %c0_34, %c0_35] : memref<12x8x1xf32, #tpu.memory_space<vmem>>, vector<1x8x1xf32>
    %74 = vector.shape_cast %73 : vector<1x8x1xf32> to vector<8x1xf32>
    %75 = vector.broadcast %74 : vector<8x1xf32> to vector<8x256xf32>
    %76 = arith.addf %72, %75 : vector<8x256xf32>
    %cst_36 = arith.constant 0.000000e+00 : f32
    %77 = vector.broadcast %cst_36 : f32 to vector<8x256xf32>
    %78 = arith.maximumf %76, %77 : vector<8x256xf32>
    %c4 = arith.constant 4 : index
    %c0_37 = arith.constant 0 : index
    %c0_38 = arith.constant 0 : index
    %79 = vector.load %arg4[%c4, %c0_37, %c0_38] : memref<12x8x128xf32, #tpu.memory_space<vmem>>, vector<1x8x128xf32>
    %80 = vector.shape_cast %79 : vector<1x8x128xf32> to vector<8x128xf32>
    %81 = vector.extract_strided_slice %80 {offsets = [0, 0], sizes = [8, 8], strides = [1, 1]} : vector<8x128xf32> to vector<8x8xf32>
    %cst_39 = arith.constant dense<0.000000e+00> : vector<8x256xf32>
    %82 = tpu.matmul %81, %78, %cst_39 {dimension_numbers = #tpu.dot_dimension_numbers<[1], [0], [0], [1], [0, 0, 1, 1], [], []>} : vector<8x8xf32>, vector<8x256xf32>, vector<8x256xf32> -> vector<8x256xf32>
    %c4_40 = arith.constant 4 : index
    %c0_41 = arith.constant 0 : index
    %c0_42 = arith.constant 0 : index
    %83 = vector.load %arg5[%c4_40, %c0_41, %c0_42] : memref<12x8x1xf32, #tpu.memory_space<vmem>>, vector<1x8x1xf32>
    %84 = vector.shape_cast %83 : vector<1x8x1xf32> to vector<8x1xf32>
    %85 = vector.broadcast %84 : vector<8x1xf32> to vector<8x256xf32>
    %86 = arith.addf %82, %85 : vector<8x256xf32>
    %87 = arith.addf %53, %86 : vector<8x256xf32>
    %c5 = arith.constant 5 : index
    %c0_43 = arith.constant 0 : index
    %c0_44 = arith.constant 0 : index
    %88 = vector.load %arg4[%c5, %c0_43, %c0_44] : memref<12x8x128xf32, #tpu.memory_space<vmem>>, vector<1x8x128xf32>
    %89 = vector.shape_cast %88 : vector<1x8x128xf32> to vector<8x128xf32>
    %90 = vector.extract_strided_slice %89 {offsets = [0, 0], sizes = [8, 8], strides = [1, 1]} : vector<8x128xf32> to vector<8x8xf32>
    %cst_45 = arith.constant dense<0.000000e+00> : vector<8x256xf32>
    %91 = tpu.matmul %90, %87, %cst_45 {dimension_numbers = #tpu.dot_dimension_numbers<[1], [0], [0], [1], [0, 0, 1, 1], [], []>} : vector<8x8xf32>, vector<8x256xf32>, vector<8x256xf32> -> vector<8x256xf32>
    %c5_46 = arith.constant 5 : index
    %c0_47 = arith.constant 0 : index
    %c0_48 = arith.constant 0 : index
    %92 = vector.load %arg5[%c5_46, %c0_47, %c0_48] : memref<12x8x1xf32, #tpu.memory_space<vmem>>, vector<1x8x1xf32>
    %93 = vector.shape_cast %92 : vector<1x8x1xf32> to vector<8x1xf32>
    %94 = vector.broadcast %93 : vector<8x1xf32> to vector<8x256xf32>
    %95 = arith.addf %91, %94 : vector<8x256xf32>
    %c0_49 = arith.constant 0 : index
    %c0_50 = arith.constant 0 : index
    %c0_51 = arith.constant 0 : index
    %96 = vector.load %arg6[%c0_49, %c0_50, %c0_51] : memref<2x8x256xf32, #tpu.memory_space<vmem>>, vector<1x8x256xf32>
    %97 = vector.shape_cast %96 : vector<1x8x256xf32> to vector<8x256xf32>
    %98 = vector.shape_cast %95 : vector<8x256xf32> to vector<1x8x256xf32>
    tpu.vector_store %arg6[%c0_49, %c0_50, %c0_51], %98 {strides = array<i32>} : memref<2x8x256xf32, #tpu.memory_space<vmem>>, vector<1x8x256xf32>,
    %cst_52 = arith.constant -1.000000e+30 : f32
    %99 = vector.shape_cast %4 : vector<8x1xi1> to vector<8x1xi1>
    %100 = vector.broadcast %99 : vector<8x1xi1> to vector<8x256xi1>
    %101 = vector.broadcast %cst_52 : f32 to vector<8x256xf32>
    %102 = arith.select %100, %95, %101 : vector<8x256xi1>, vector<8x256xf32>
    %cst_53 = arith.constant dense<0xFF800000> : vector<256xf32>
    %103 = vector.multi_reduction <maximumf>, %102, %cst_53 [0] : vector<8x256xf32> to vector<256xf32>
    %104 = vector.shape_cast %103 : vector<256xf32> to vector<1x256xf32>
    %105 = vector.broadcast %104 : vector<1x256xf32> to vector<8x256xf32>
    %106 = arith.subf %102, %105 : vector<8x256xf32>
    %107 = math.exp %106 : vector<8x256xf32>
    %cst_54 = arith.constant dense<0.000000e+00> : vector<256xf32>
    %108 = vector.multi_reduction <add>, %107, %cst_54 [0] : vector<8x256xf32> to vector<256xf32>
    %109 = vector.shape_cast %108 : vector<256xf32> to vector<1x256xf32>
    %110 = vector.broadcast %109 : vector<1x256xf32> to vector<8x256xf32>
    %111 = arith.divf %107, %110 : vector<8x256xf32>
    %c6 = arith.constant 6 : index
    %c0_55 = arith.constant 0 : index
    %c0_56 = arith.constant 0 : index
    %112 = vector.load %arg4[%c6, %c0_55, %c0_56] : memref<12x8x128xf32, #tpu.memory_space<vmem>>, vector<1x8x128xf32>
    %113 = vector.shape_cast %112 : vector<1x8x128xf32> to vector<8x128xf32>
    %114 = vector.extract_strided_slice %113 {offsets = [0, 0], sizes = [8, 8], strides = [1, 1]} : vector<8x128xf32> to vector<8x8xf32>
    %cst_57 = arith.constant dense<0.000000e+00> : vector<8x256xf32>
    %115 = tpu.matmul %114, %111, %cst_57 {dimension_numbers = #tpu.dot_dimension_numbers<[1], [0], [0], [1], [0, 0, 1, 1], [], []>} : vector<8x8xf32>, vector<8x256xf32>, vector<8x256xf32> -> vector<8x256xf32>
    %c6_58 = arith.constant 6 : index
    %c0_59 = arith.constant 0 : index
    %c0_60 = arith.constant 0 : index
    %116 = vector.load %arg5[%c6_58, %c0_59, %c0_60] : memref<12x8x1xf32, #tpu.memory_space<vmem>>, vector<1x8x1xf32>
    %117 = vector.shape_cast %116 : vector<1x8x1xf32> to vector<8x1xf32>
    %118 = vector.broadcast %117 : vector<8x1xf32> to vector<8x256xf32>
    %119 = arith.addf %115, %118 : vector<8x256xf32>
    %120 = vector.broadcast %0 : vector<1x256xf32> to vector<8x256xf32>
    %121 = arith.mulf %119, %120 : vector<8x256xf32>
    %c1_i32_61 = arith.constant 1 : i32
    %122 = vector.broadcast %c1_i32_61 : i32 to vector<1x256xi32>
    %123 = arith.cmpi sge, %1, %122 : vector<1x256xi32>
    %c1_i32_62 = arith.constant 1 : i32
    %124 = tpu.dynamic_rotate %121 by %c1_i32_62 dim 1 : vector<8x256xf32>, i32 -> vector<8x256xf32>
    %cst_63 = arith.constant 0.000000e+00 : f32
    %125 = vector.shape_cast %123 : vector<1x256xi1> to vector<1x256xi1>
    %126 = vector.broadcast %125 : vector<1x256xi1> to vector<8x256xi1>
    %127 = vector.broadcast %cst_63 : f32 to vector<8x256xf32>
    %128 = arith.select %126, %124, %127 : vector<8x256xi1>, vector<8x256xf32>
    %c127_i32_64 = arith.constant 127 : i32
    %129 = vector.broadcast %c127_i32_64 : i32 to vector<1x256xi32>
    %130 = arith.cmpi slt, %1, %129 : vector<1x256xi32>
    %c255_i32_65 = arith.constant 255 : i32
    %131 = tpu.dynamic_rotate %121 by %c255_i32_65 dim 1 : vector<8x256xf32>, i32 -> vector<8x256xf32>
    %cst_66 = arith.constant 0.000000e+00 : f32
    %132 = vector.shape_cast %130 : vector<1x256xi1> to vector<1x256xi1>
    %133 = vector.broadcast %132 : vector<1x256xi1> to vector<8x256xi1>
    %134 = vector.broadcast %cst_66 : f32 to vector<8x256xf32>
    %135 = arith.select %133, %131, %134 : vector<8x256xi1>, vector<8x256xf32>
    %136 = tpu.concatenate %128, %121, %135 in 0 : vector<8x256xf32>, vector<8x256xf32>, vector<8x256xf32> -> vector<24x256xf32>
    %c7 = arith.constant 7 : index
    %c0_67 = arith.constant 0 : index
    %c0_68 = arith.constant 0 : index
    %137 = vector.load %arg4[%c7, %c0_67, %c0_68] : memref<12x8x128xf32, #tpu.memory_space<vmem>>, vector<1x8x128xf32>
    %138 = vector.shape_cast %137 : vector<1x8x128xf32> to vector<8x128xf32>
    %139 = vector.extract_strided_slice %138 {offsets = [0, 0], sizes = [8, 24], strides = [1, 1]} : vector<8x128xf32> to vector<8x24xf32>
    %cst_69 = arith.constant dense<0.000000e+00> : vector<8x256xf32>
    %140 = tpu.matmul %139, %136, %cst_69 {dimension_numbers = #tpu.dot_dimension_numbers<[1], [0], [0], [1], [0, 0, 1, 1], [], []>} : vector<8x24xf32>, vector<24x256xf32>, vector<8x256xf32> -> vector<8x256xf32>
    %c7_70 = arith.constant 7 : index
    %c0_71 = arith.constant 0 : index
    %c0_72 = arith.constant 0 : index
    %141 = vector.load %arg5[%c7_70, %c0_71, %c0_72] : memref<12x8x1xf32, #tpu.memory_space<vmem>>, vector<1x8x1xf32>
    %142 = vector.shape_cast %141 : vector<1x8x1xf32> to vector<8x1xf32>
    %143 = vector.broadcast %142 : vector<8x1xf32> to vector<8x256xf32>
    %144 = arith.addf %140, %143 : vector<8x256xf32>
    %cst_73 = arith.constant 0.000000e+00 : f32
    %145 = vector.broadcast %cst_73 : f32 to vector<8x256xf32>
    %146 = arith.maximumf %144, %145 : vector<8x256xf32>
    %c8 = arith.constant 8 : index
    %c0_74 = arith.constant 0 : index
    %c0_75 = arith.constant 0 : index
    %147 = vector.load %arg4[%c8, %c0_74, %c0_75] : memref<12x8x128xf32, #tpu.memory_space<vmem>>, vector<1x8x128xf32>
    %148 = vector.shape_cast %147 : vector<1x8x128xf32> to vector<8x128xf32>
    %149 = vector.extract_strided_slice %148 {offsets = [0, 0], sizes = [8, 8], strides = [1, 1]} : vector<8x128xf32> to vector<8x8xf32>
    %cst_76 = arith.constant dense<0.000000e+00> : vector<8x256xf32>
    %150 = tpu.matmul %149, %146, %cst_76 {dimension_numbers = #tpu.dot_dimension_numbers<[1], [0], [0], [1], [0, 0, 1, 1], [], []>} : vector<8x8xf32>, vector<8x256xf32>, vector<8x256xf32> -> vector<8x256xf32>
    %c8_77 = arith.constant 8 : index
    %c0_78 = arith.constant 0 : index
    %c0_79 = arith.constant 0 : index
    %151 = vector.load %arg5[%c8_77, %c0_78, %c0_79] : memref<12x8x1xf32, #tpu.memory_space<vmem>>, vector<1x8x1xf32>
    %152 = vector.shape_cast %151 : vector<1x8x1xf32> to vector<8x1xf32>
    %153 = vector.broadcast %152 : vector<8x1xf32> to vector<8x256xf32>
    %154 = arith.addf %150, %153 : vector<8x256xf32>
    %155 = arith.addf %121, %154 : vector<8x256xf32>
    %156 = vector.broadcast %0 : vector<1x256xf32> to vector<8x256xf32>
    %157 = arith.mulf %155, %156 : vector<8x256xf32>
    %c2_i32_80 = arith.constant 2 : i32
    %158 = vector.broadcast %c2_i32_80 : i32 to vector<1x256xi32>
    %159 = arith.cmpi sge, %1, %158 : vector<1x256xi32>
    %c2_i32_81 = arith.constant 2 : i32
    %160 = tpu.dynamic_rotate %157 by %c2_i32_81 dim 1 : vector<8x256xf32>, i32 -> vector<8x256xf32>
    %cst_82 = arith.constant 0.000000e+00 : f32
    %161 = vector.shape_cast %159 : vector<1x256xi1> to vector<1x256xi1>
    %162 = vector.broadcast %161 : vector<1x256xi1> to vector<8x256xi1>
    %163 = vector.broadcast %cst_82 : f32 to vector<8x256xf32>
    %164 = arith.select %162, %160, %163 : vector<8x256xi1>, vector<8x256xf32>
    %c126_i32_83 = arith.constant 126 : i32
    %165 = vector.broadcast %c126_i32_83 : i32 to vector<1x256xi32>
    %166 = arith.cmpi slt, %1, %165 : vector<1x256xi32>
    %c254_i32_84 = arith.constant 254 : i32
    %167 = tpu.dynamic_rotate %157 by %c254_i32_84 dim 1 : vector<8x256xf32>, i32 -> vector<8x256xf32>
    %cst_85 = arith.constant 0.000000e+00 : f32
    %168 = vector.shape_cast %166 : vector<1x256xi1> to vector<1x256xi1>
    %169 = vector.broadcast %168 : vector<1x256xi1> to vector<8x256xi1>
    %170 = vector.broadcast %cst_85 : f32 to vector<8x256xf32>
    %171 = arith.select %169, %167, %170 : vector<8x256xi1>, vector<8x256xf32>
    %172 = tpu.concatenate %164, %157, %171 in 0 : vector<8x256xf32>, vector<8x256xf32>, vector<8x256xf32> -> vector<24x256xf32>
    %c9 = arith.constant 9 : index
    %c0_86 = arith.constant 0 : index
    %c0_87 = arith.constant 0 : index
    %173 = vector.load %arg4[%c9, %c0_86, %c0_87] : memref<12x8x128xf32, #tpu.memory_space<vmem>>, vector<1x8x128xf32>
    %174 = vector.shape_cast %173 : vector<1x8x128xf32> to vector<8x128xf32>
    %175 = vector.extract_strided_slice %174 {offsets = [0, 0], sizes = [8, 24], strides = [1, 1]} : vector<8x128xf32> to vector<8x24xf32>
    %cst_88 = arith.constant dense<0.000000e+00> : vector<8x256xf32>
    %176 = tpu.matmul %175, %172, %cst_88 {dimension_numbers = #tpu.dot_dimension_numbers<[1], [0], [0], [1], [0, 0, 1, 1], [], []>} : vector<8x24xf32>, vector<24x256xf32>, vector<8x256xf32> -> vector<8x256xf32>
    %c9_89 = arith.constant 9 : index
    %c0_90 = arith.constant 0 : index
    %c0_91 = arith.constant 0 : index
    %177 = vector.load %arg5[%c9_89, %c0_90, %c0_91] : memref<12x8x1xf32, #tpu.memory_space<vmem>>, vector<1x8x1xf32>
    %178 = vector.shape_cast %177 : vector<1x8x1xf32> to vector<8x1xf32>
    %179 = vector.broadcast %178 : vector<8x1xf32> to vector<8x256xf32>
    %180 = arith.addf %176, %179 : vector<8x256xf32>
    %cst_92 = arith.constant 0.000000e+00 : f32
    %181 = vector.broadcast %cst_92 : f32 to vector<8x256xf32>
    %182 = arith.maximumf %180, %181 : vector<8x256xf32>
    %c10 = arith.constant 10 : index
    %c0_93 = arith.constant 0 : index
    %c0_94 = arith.constant 0 : index
    %183 = vector.load %arg4[%c10, %c0_93, %c0_94] : memref<12x8x128xf32, #tpu.memory_space<vmem>>, vector<1x8x128xf32>
    %184 = vector.shape_cast %183 : vector<1x8x128xf32> to vector<8x128xf32>
    %185 = vector.extract_strided_slice %184 {offsets = [0, 0], sizes = [8, 8], strides = [1, 1]} : vector<8x128xf32> to vector<8x8xf32>
    %cst_95 = arith.constant dense<0.000000e+00> : vector<8x256xf32>
    %186 = tpu.matmul %185, %182, %cst_95 {dimension_numbers = #tpu.dot_dimension_numbers<[1], [0], [0], [1], [0, 0, 1, 1], [], []>} : vector<8x8xf32>, vector<8x256xf32>, vector<8x256xf32> -> vector<8x256xf32>
    %c10_96 = arith.constant 10 : index
    %c0_97 = arith.constant 0 : index
    %c0_98 = arith.constant 0 : index
    %187 = vector.load %arg5[%c10_96, %c0_97, %c0_98] : memref<12x8x1xf32, #tpu.memory_space<vmem>>, vector<1x8x1xf32>
    %188 = vector.shape_cast %187 : vector<1x8x1xf32> to vector<8x1xf32>
    %189 = vector.broadcast %188 : vector<8x1xf32> to vector<8x256xf32>
    %190 = arith.addf %186, %189 : vector<8x256xf32>
    %191 = arith.addf %157, %190 : vector<8x256xf32>
    %c11 = arith.constant 11 : index
    %c0_99 = arith.constant 0 : index
    %c0_100 = arith.constant 0 : index
    %192 = vector.load %arg4[%c11, %c0_99, %c0_100] : memref<12x8x128xf32, #tpu.memory_space<vmem>>, vector<1x8x128xf32>
    %193 = vector.shape_cast %192 : vector<1x8x128xf32> to vector<8x128xf32>
    %194 = vector.extract_strided_slice %193 {offsets = [0, 0], sizes = [8, 8], strides = [1, 1]} : vector<8x128xf32> to vector<8x8xf32>
    %cst_101 = arith.constant dense<0.000000e+00> : vector<8x256xf32>
    %195 = tpu.matmul %194, %191, %cst_101 {dimension_numbers = #tpu.dot_dimension_numbers<[1], [0], [0], [1], [0, 0, 1, 1], [], []>} : vector<8x8xf32>, vector<8x256xf32>, vector<8x256xf32> -> vector<8x256xf32>
    %c11_102 = arith.constant 11 : index
    %c0_103 = arith.constant 0 : index
    %c0_104 = arith.constant 0 : index
    %196 = vector.load %arg5[%c11_102, %c0_103, %c0_104] : memref<12x8x1xf32, #tpu.memory_space<vmem>>, vector<1x8x1xf32>
    %197 = vector.shape_cast %196 : vector<1x8x1xf32> to vector<8x1xf32>
    %198 = vector.broadcast %197 : vector<8x1xf32> to vector<8x256xf32>
    %199 = arith.addf %195, %198 : vector<8x256xf32>
    %c1_105 = arith.constant 1 : index
    %c0_106 = arith.constant 0 : index
    %c0_107 = arith.constant 0 : index
    %200 = vector.load %arg6[%c1_105, %c0_106, %c0_107] : memref<2x8x256xf32, #tpu.memory_space<vmem>>, vector<1x8x256xf32>
    %201 = vector.shape_cast %200 : vector<1x8x256xf32> to vector<8x256xf32>
    %202 = vector.shape_cast %199 : vector<8x256xf32> to vector<1x8x256xf32>
    tpu.vector_store %arg6[%c1_105, %c0_106, %c0_107], %202 {strides = array<i32>} : memref<2x8x256xf32, #tpu.memory_space<vmem>>, vector<1x8x256xf32>,
    %c16_i32 = arith.constant 16 : i32
    %203 = vector.broadcast %c16_i32 : i32 to vector<1x256xi32>
    %204 = arith.cmpi slt, %1, %203 : vector<1x256xi32>
    %205 = vector.broadcast %0 : vector<1x256xf32> to vector<8x256xf32>
    %206 = arith.mulf %199, %205 : vector<8x256xf32>
    %cst_108 = arith.constant -1.000000e+30 : f32
    %207 = vector.shape_cast %204 : vector<1x256xi1> to vector<1x256xi1>
    %208 = vector.broadcast %207 : vector<1x256xi1> to vector<8x256xi1>
    %209 = vector.broadcast %cst_108 : f32 to vector<8x256xf32>
    %210 = arith.select %208, %206, %209 : vector<8x256xi1>, vector<8x256xf32>
    %211 = vector.extract_strided_slice %210 {offsets = [0, 0], sizes = [8, 128], strides = [1, 1]} : vector<8x256xf32> to vector<8x128xf32>
    %cst_109 = arith.constant dense<0xFF800000> : vector<8xf32>
    %212 = vector.multi_reduction <maximumf>, %211, %cst_109 [1] : vector<8x128xf32> to vector<8xf32>
    %213 = vector.shape_cast %212 : vector<8xf32> to vector<8x1xf32>
    %214 = vector.broadcast %213 : vector<8x1xf32> to vector<8x128xf32>
    %215 = arith.subf %211, %214 : vector<8x128xf32>
    %216 = math.exp %215 : vector<8x128xf32>
    %cst_110 = arith.constant dense<0.000000e+00> : vector<8xf32>
    %217 = vector.multi_reduction <add>, %216, %cst_110 [1] : vector<8x128xf32> to vector<8xf32>
    %218 = vector.shape_cast %217 : vector<8xf32> to vector<8x1xf32>
    %219 = vector.broadcast %218 : vector<8x1xf32> to vector<8x128xf32>
    %220 = arith.divf %216, %219 : vector<8x128xf32>
    %c0_111 = arith.constant 0 : index
    %c0_112 = arith.constant 0 : index
    %221 = vector.load %arg7[%c0_111, %c0_112] : memref<8x256xf32, #tpu.memory_space<vmem>>, vector<8x128xf32>
    tpu.vector_store %arg7[%c0_111, %c0_112], %220 {strides = array<i32>} : memref<8x256xf32, #tpu.memory_space<vmem>>, vector<8x128xf32>,
    %222 = vector.extract_strided_slice %210 {offsets = [0, 128], sizes = [8, 128], strides = [1, 1]} : vector<8x256xf32> to vector<8x128xf32>
    %cst_113 = arith.constant dense<0xFF800000> : vector<8xf32>
    %223 = vector.multi_reduction <maximumf>, %222, %cst_113 [1] : vector<8x128xf32> to vector<8xf32>
    %224 = vector.shape_cast %223 : vector<8xf32> to vector<8x1xf32>
    %225 = vector.broadcast %224 : vector<8x1xf32> to vector<8x128xf32>
    %226 = arith.subf %222, %225 : vector<8x128xf32>
    %227 = math.exp %226 : vector<8x128xf32>
    %cst_114 = arith.constant dense<0.000000e+00> : vector<8xf32>
    %228 = vector.multi_reduction <add>, %227, %cst_114 [1] : vector<8x128xf32> to vector<8xf32>
    %229 = vector.shape_cast %228 : vector<8xf32> to vector<8x1xf32>
    %230 = vector.broadcast %229 : vector<8x1xf32> to vector<8x128xf32>
    %231 = arith.divf %227, %230 : vector<8x128xf32>
    %c0_115 = arith.constant 0 : index
    %c128 = arith.constant 128 : index
    %232 = vector.load %arg7[%c0_115, %c128] : memref<8x256xf32, #tpu.memory_space<vmem>>, vector<8x128xf32>
    tpu.vector_store %arg7[%c0_115, %c128], %231 {strides = array<i32>} : memref<8x256xf32, #tpu.memory_space<vmem>>, vector<8x128xf32>,
    return
  }
  func.func @transform_0(%arg0: i32) -> (i32, i32) {
    %c0_i32 = arith.constant 0 : i32
    %c0_i32_0 = arith.constant 0 : i32
    %c0_i32_1 = arith.constant 0 : i32
    return %c0_i32, %c0_i32_0 : i32, i32
  }
  func.func @transform_1(%arg0: i32) -> (i32, i32) {
    %c0_i32 = arith.constant 0 : i32
    %c0_i32_0 = arith.constant 0 : i32
    %c0_i32_1 = arith.constant 0 : i32
    return %c0_i32, %c0_i32_0 : i32, i32
  }
  func.func @transform_2(%arg0: i32) -> (i32, i32) {
    %c0_i32 = arith.constant 0 : i32
    %c0_i32_0 = arith.constant 0 : i32
    %c0_i32_1 = arith.constant 0 : i32
    return %c0_i32, %c0_i32_0 : i32, i32
  }
  func.func @transform_3(%arg0: i32) -> (i32, i32, i32) {
    %c0_i32 = arith.constant 0 : i32
    %c0_i32_0 = arith.constant 0 : i32
    %c0_i32_1 = arith.constant 0 : i32
    %c0_i32_2 = arith.constant 0 : i32
    return %c0_i32, %c0_i32_0, %c0_i32_1 : i32, i32, i32
  }
  func.func @transform_4(%arg0: i32) -> (i32, i32, i32) {
    %c0_i32 = arith.constant 0 : i32
    %c0_i32_0 = arith.constant 0 : i32
    %c0_i32_1 = arith.constant 0 : i32
    %c0_i32_2 = arith.constant 0 : i32
    return %c0_i32, %c0_i32_0, %c0_i32_1 : i32, i32, i32
  }
  func.func @transform_5(%arg0: i32) -> (i32, i32, i32) {
    %c0_i32 = arith.constant 0 : i32
    %c0_i32_0 = arith.constant 0 : i32
    %c0_i32_1 = arith.constant 0 : i32
    %c0_i32_2 = arith.constant 0 : i32
    return %c0_i32, %c0_i32_0, %c0_i32_1 : i32, i32, i32
  }
  func.func @transform_6(%arg0: i32) -> (i32, i32) {
    %c0_i32 = arith.constant 0 : i32
    %c0_i32_0 = arith.constant 0 : i32
    %c0_i32_1 = arith.constant 0 : i32
    return %c0_i32, %c0_i32_0 : i32, i32
  }
}

</mosaic_0001>

<bundles_post_ra>
// kernel: tpu_custom_call.1
= control target key start
LH: loop header
LB: loop body
LE: loop exit
PB: predicated region body
PF: predicated region fallthrough
CT: control target
= control target key end

     0   :  { %12 = vsyncpa [#allocation3], 0  ;;  %s1822_s0 = inlined_call_operand.hbm [shape: f32[12,256], index: 0, kind: input, shape index: {}]   ;;  %s1823_s1 = inlined_call_operand.vmem [shape: f32[1,256], index: 1, kind: input, shape index: {}]   ;;  %s1824_s2 = inlined_call_operand.vmem [shape: s32[1,256], index: 2, kind: input, shape index: {}]   ;;  %s1825_s3 = inlined_call_operand.vmem [shape: f32[12,8,128], index: 3, kind: input, shape index: {}]   ;;  %s1826_s4 = inlined_call_operand.vmem [shape: f32[12,8,1], index: 4, kind: input, shape index: {}]   ;;  %s1827_s5 = inlined_call_operand.hbm [shape: f32[2,8,256], index: 5, kind: output, shape index: {0}]   ;;  %s1828_s6 = inlined_call_operand.hbm [shape: f32[8,256], index: 6, kind: output, shape index: {1}]  }
   0x1   :  { %13 = vsyncpa [#allocation4], 0 }
   0x2   :  { %14 = vsyncpa [#allocation7], 0  ;;  %s1465_s21 = smov [#allocation2]  }
   0x3   :  { %s20_s22 = sshll.u32 %s1465_s21, 4  ;;  %s21_s22 = int_to_ptr.vmem [resolvable:$true] %s20_s22 }
   0x4   :  { %s1407_s23 = scalar_lea.vmem %s21_s22, 512  ;;  %p1412_p1 = scmp.lt.s32.totalorder %s21_s22, %s21_s22 }
   0x5   :  { %p1408_p0 = scmp.ne.s32.totalorder %s21_s22, %s1407_s23  ;;  %p1413_p2 = scmp.lt.s32.totalorder %s1407_s23, %s1407_s23 }
   0x7   :  { %p1414_p3 = por %p1413_p2, %p1412_p1 }
   0x9   :  { %p1415_p4 = pnand %p1414_p3, %p1408_p0 }
   0xb   :  { %1418 = shalt.err (!%p1415_p4)
}
   0xc   :  { %s1466_s24 = smov 256   ;;  %s1467_s25 = smov 16  }
   0xd   :  { %26 = dma.hbm_to_vmem [thread:$0]  %s1822_s0, 512, %s21_s22, [#allocation3], %s1466_s24, %s1466_s24, %s1467_s25  }
   0xe   :  { %1459 = dma.done.wait [#allocation3], 512  }
   0xf   :  { %1460 = vsyncadd [#allocation3], 4294966784  ;;  %v40_v0 = vlaneseq  ;;  %v1468_v1 = vmov 0.0   ;;  %v1469_v3 = vmov 0   ;;  %v38_v6 = vld [vmem:[%s1823_s1] sm:$0x3] }
  0x10   :  { %144 = vmatprep.mubr.f32.mxu0 %v1468_v1  ;;  %274 = vmatprep.mubr.f32.mxu1 %v1468_v1  ;;  %v46_v7 = vld [vmem:[#allocation2 + $0x18] sm:$0xf]  ;;  %v45_v8 = vld [vmem:[#allocation2 + $0x10] sm:$0xf]  ;;  %v44_v11 = vld [vmem:[#allocation2 + $0x8] sm:$0xff]  ;;  %vm73_vm0 = vcmask 1043456  }
  0x11   :  { %v1519_v2 = vshrl.u32 %v40_v0, 7  ;;  %1381 = vset.pattern.permute.xlu0 %v1469_v3  ;;  %1382 = vset.pattern.permute.xlu1 %v1469_v3  ;;  %v43_v12 = vld [vmem:[#allocation2] sm:$0xff]  ;;  %vm69_vm1 = vcmask 97280   ;;  %s1470_s8 = smov 127   ;;  %s1471_s9 = smov 1   ;;  %v1329_v26 = vld [vmem:[%s1826_s4 + $0x10] sm:$0xff] }
  0x12   :  { %v63_v13 = vld [vmem:[%s1826_s4] sm:$0xff]  ;;  %v1322_v27 = vld [vmem:[%s1826_s4 + $0x8] sm:$0xff]  ;;  %v1577_v30 = vand.u32 127, %v40_v0  ;;  %vm206_vm10 = vcmask 195584   ;;  %v1328_v56 = vld [vmem:[%s1825_s3 + $0x10] sm:$0xff]  ;;  %vm292_vm11 = vcmask 64512  }
  0x13   :  { %v1524_v4 = vsub.s32 0, %v1519_v2  ;;  %v1527_v5 = vsub.s32 1, %v1519_v2  ;;  %66 = vperm.xlu0 %1381, %v63_v13   ;;  %v62_v18 = vld [vmem:[%s1825_s3] sm:$0xff]  ;;  %v1321_v48 = vld [vmem:[%s1825_s3 + $0x8] sm:$0xff]  ;;  %s1472_s19 = smov 126   ;;  %s1473_s20 = smov 2  }
  0x14   :  { %v1572_v28 = vld [vmem:[%s1824_s2] sm:$0x3]  ;;  %vm181_vm4 = vcmp.lt.s32.totalorder %v1577_v30, 127  ;;  %vm160_vm7 = vcmp.lt.s32.totalorder %v1577_v30, 1  ;;  %vm397_vm14 = vcmp.lt.s32.totalorder %v1577_v30, 126 }
  0x15   :  { %v1533_v9 = vrot.slane %v38_v6, %v1524_v4  ;;  %v1536_v10 = vrot.slane %v38_v6, %v1527_v5  ;;  %vm176_vm2 = vcmp.lt.s32.totalorder %v1572_v28, 127  ;;  %vm153_vm3 = vcmp.ge.s32.totalorder %v1572_v28, 1 }
  0x16   :  { %v184_v29 = vsel %vm176_vm2, 1, %v1469_v3  ;;  %v163_v33 = vsel %vm153_vm3, 1, %v1469_v3  ;;  %vm392_vm12 = vcmp.lt.s32.totalorder %v1572_v28, 126  ;;  %vm371_vm13 = vcmp.ge.s32.totalorder %v1572_v28, 2 }
  0x17   :  { %v61_v14 = vmul.f32 %v1536_v10, %v46_v7  ;;  %v60_v15 = vmul.f32 %v1533_v9, %v45_v8  ;;  %v59_v16 = vmul.f32 %v1536_v10, %v44_v11  ;;  %v58_v17 = vmul.f32 %v1533_v9, %v43_v12  ;;  %v1332_v7 = vld [vmem:[%s1826_s4 + $0x18] sm:$0xff]  ;;  %v1339_v8 = vld [vmem:[%s1826_s4 + $0x20] sm:$0xff]  ;;  %v1342_v11 = vld [vmem:[%s1826_s4 + $0x28] sm:$0xff] }
  0x18   :  { %v192_v31 = vrot.slane %v184_v29, %v1527_v5  ;;  %v188_v32 = vrot.slane %v184_v29, %v1524_v4  ;;  %v171_v36 = vrot.slane %v163_v33, %v1527_v5  ;;  %v167_v39 = vrot.slane %v163_v33, %v1524_v4  ;;  %v1345_v12 = vld [vmem:[%s1826_s4 + $0x30] sm:$0xff]  ;;  %v1331_v33 = vld [vmem:[%s1825_s3 + $0x18] sm:$0xff] }
  0x19   :  { %1318 = vmatprep.subr.msk.mxu0 %vm73_vm0, %v61_v14  ;;  %v400_v13 = vsel %vm392_vm12, 1, %v1469_v3  ;;  %vm42_vm12 = vcmp.lt.s32.totalorder %v1519_v2, 4 }
  0x1a   :  { %1319 = vmatpush1.msk.msra.mxu0 %vm73_vm0, %v60_v15  ;;  %vm1583_vm5 = vcmp.eq.s32.totalorder %v192_v31, 1  ;;  %vm1588_vm6 = vcmp.eq.s32.totalorder %v188_v32, 1  ;;  %vm1602_vm8 = vcmp.eq.s32.totalorder %v171_v36, 1  ;;  %vm1607_vm9 = vcmp.eq.s32.totalorder %v167_v39, 1 }
  0x1b   :  { %110 = vmatprep.subr.mxu0 %v59_v16  ;;  %v408_v14 = vrot.slane %v400_v13, %v1527_v5  ;;  %v404_v15 = vrot.slane %v400_v13, %v1524_v4  ;;  %v379_v16 = vsel %vm371_vm13, 1, %v1469_v3 }
  0x1c   :  { %111 = vmatpush1.msra.mxu0 %v58_v17 }
  0x1d   :  { %1320 = vmatmul.mubr.msk.f32.vlgmr.msra.gmra.mxu0 %vm69_vm1, %v62_v18  ;;  %vm1665_vm15 = vcmp.eq.s32.totalorder %v408_v14, 1  ;;  %vm1670_vm0 = vcmp.eq.s32.totalorder %v404_v15, 1  ;;  %vm376_vm1 = vcmp.lt.s32.totalorder %v1577_v30, 2 }
  0x1e   :  { %360 = vmatprep.mubr.f32.mxu0 %v1468_v1 }
  0x8e   :  { %v67_v19 = vpop.permute.xlu0 %66 }
  0xdd   :  { %v146_v20 = vpop.f32.mrf.mxu0 }
  0xde   :  { %v147_v21 = vadd.f32 %v146_v20, %v67_v19 }
  0xdf   :  { %v148_v22 = vpop.f32.mrf.mxu0 }
  0xe0   :  { %v1550_v23 = vmul.f32 %v147_v21, %v1533_v9  ;;  %v149_v24 = vadd.f32 %v148_v22, %v67_v19  ;;  %v387_v19 = vrot.slane %v379_v16, %v1527_v5  ;;  %v383_v22 = vrot.slane %v379_v16, %v1524_v4 }
  0xe2   :  { %v1553_v25 = vmul.f32 %v149_v24, %v1536_v10  ;;  %177 = vrot.lane.b32.xlu0 %v1550_v23, %s1470_s8  ;;  %vm1684_vm2 = vcmp.eq.s32.totalorder %v387_v19, 1  ;;  %vm1689_vm3 = vcmp.eq.s32.totalorder %v383_v22, 1 }
  0xe4   :  { %179 = vrot.lane.b32.xlu1 %v1553_v25, %s1470_s8 }
  0xe6   :  { %156 = vrot.lane.b32.xlu0 %v1553_v25, %s1471_s9 }
  0xe8   :  { %154 = vrot.lane.b32.xlu1 %v1550_v23, %s1471_s9 }
  0xea   :  { %289 = vperm.xlu0 %1381, %v1329_v26  }
  0xec   :  { %203 = vperm.xlu1 %1382, %v1322_v27  }
 0x154   :  { %v178_v34 = vpop.permute.xlu0 %177 }
 0x156   :  { %v180_v37 = vpop.permute.xlu1 %179 }
 0x157   :  { %v183_v40 = vsel %vm181_vm4, %v180_v37, %v178_v34  ;;  %v182_v41 = vsel %vm181_vm4, %v178_v34, %v180_v37 }
 0x158   :  { %1323 = vmatprep.subr.msk.mxu1 %vm1583_vm5, %v183_v40  ;;  %v157_v43 = vpop.permute.xlu0 %156 }
 0x159   :  { %1324 = vmatpush1.msk.msra.mxu1 %vm1588_vm6, %v182_v41 }
 0x15a   :  { %v155_v44 = vpop.permute.xlu1 %154  ;;  %238 = vmatprep.subr.mxu1 %v1553_v25 }
 0x15b   :  { %v161_v46 = vsel %vm160_vm7, %v155_v44, %v157_v43  ;;  %v162_v47 = vsel %vm160_vm7, %v157_v43, %v155_v44  ;;  %239 = vmatpush1.msra.mxu1 %v1550_v23  ;;  %v1338_v44 = vld [vmem:[%s1825_s3 + $0x20] sm:$0xff] }
 0x15c   :  { %1325 = vmatprep.subr.msk.mxu1 %vm1602_vm8, %v161_v46 }
 0x15d   :  { %1326 = vmatpush1.msk.msra.mxu1 %vm1607_vm9, %v162_v47 }
 0x15e   :  { %1327 = vmatmul.mubr.msk.f32.vlgmr.msra.gmra.mxu1 %vm206_vm10, %v1321_v48 }
 0x15f   :  { %489 = vmatprep.mubr.f32.mxu1 %v1468_v1 }
 0x165   :  { %v290_v57 = vpop.permute.xlu0 %289 }
 0x167   :  { %v204_v49 = vpop.permute.xlu1 %203 }
 0x21e   :  { %v276_v50 = vpop.f32.mrf.mxu1 }
 0x21f   :  { %v277_v51 = vadd.f32 %v276_v50, %v204_v49 }
 0x220   :  { %v278_v52 = vpop.f32.mrf.mxu1 }
 0x221   :  { %v279_v53 = vadd.f32 %v278_v52, %v204_v49  ;;  %v281_v55 = vmax.f32 %v277_v51, 0.0 }
 0x223   :  { %v282_v54 = vmax.f32 %v279_v53, 0.0  ;;  %v1341_v53 = vld [vmem:[%s1825_s3 + $0x28] sm:$0xff] }
 0x225   :  { %326 = vmatprep.subr.mxu0 %v282_v54 }
 0x226   :  { %327 = vmatpush1.msra.mxu0 %v281_v55 }
 0x227   :  { %1330 = vmatmul.mubr.msk.f32.vlgmr.msra.gmra.mxu0 %vm292_vm11, %v1328_v56 }
 0x228   :  { %574 = vmatprep.mubr.f32.mxu0 %v1468_v1 }
 0x2e7   :  { %v362_v58 = vpop.f32.mrf.mxu0 }
 0x2e8   :  { %v363_v59 = vadd.f32 %v362_v58, %v290_v57 }
 0x2e9   :  { %v364_v60 = vpop.f32.mrf.mxu0 }
 0x2ea   :  { %v367_v61 = vadd.f32 %v363_v59, %v1550_v23  ;;  %v365_v62 = vadd.f32 %v364_v60, %v290_v57 }
 0x2ec   :  { %v1632_v63 = vmul.f32 %v367_v61, %v1533_v9  ;;  %v368_v0 = vadd.f32 %v365_v62, %v1553_v25 }
 0x2ee   :  { %v1636_v6 = vmul.f32 %v368_v0, %v1536_v10  ;;  %393 = vrot.lane.b32.xlu1 %v1632_v63, %s1472_s19 }
 0x2f0   :  { %395 = vrot.lane.b32.xlu0 %v1636_v6, %s1472_s19 }
 0x2f2   :  { %372 = vrot.lane.b32.xlu1 %v1632_v63, %s1473_s20 }
 0x2f4   :  { %374 = vrot.lane.b32.xlu0 %v1636_v6, %s1473_s20 }
 0x2f6   :  { %419 = vperm.xlu1 %1382, %v1332_v7  }
 0x2f8   :  { %504 = vperm.xlu0 %1381, %v1339_v8  }
 0x2fa   :  { %589 = vperm.xlu1 %1382, %v1342_v11  }
 0x2fc   :  { %712 = vperm.xlu0 %1381, %v1345_v12  }
 0x360   :  { %v394_v17 = vpop.permute.xlu1 %393 }
 0x362   :  { %v396_v20 = vpop.permute.xlu0 %395 }
 0x363   :  { %v398_v23 = vsel %vm397_vm14, %v394_v17, %v396_v20  ;;  %v399_v24 = vsel %vm397_vm14, %v396_v20, %v394_v17 }
 0x364   :  { %1333 = vmatprep.subr.msk.mxu1 %vm1665_vm15, %v399_v24  ;;  %v373_v26 = vpop.permute.xlu1 %372 }
 0x365   :  { %1334 = vmatpush1.msk.msra.mxu1 %vm1670_vm0, %v398_v23 }
 0x366   :  { %v375_v27 = vpop.permute.xlu0 %374  ;;  %453 = vmatprep.subr.mxu1 %v1636_v6 }
 0x367   :  { %v377_v31 = vsel %vm376_vm1, %v373_v26, %v375_v27  ;;  %v378_v32 = vsel %vm376_vm1, %v375_v27, %v373_v26  ;;  %454 = vmatpush1.msra.mxu1 %v1632_v63 }
 0x368   :  { %1335 = vmatprep.subr.msk.mxu1 %vm1684_vm2, %v377_v31 }
 0x369   :  { %1336 = vmatpush1.msk.msra.mxu1 %vm1689_vm3, %v378_v32 }
 0x36a   :  { %1337 = vmatmul.mubr.msk.f32.vlgmr.msra.gmra.mxu1 %vm206_vm10, %v1331_v33 }
 0x36b   :  { %782 = vmatprep.mubr.f32.mxu1 %v1468_v1 }
 0x371   :  { %v420_v36 = vpop.permute.xlu1 %419 }
 0x373   :  { %v505_v47 = vpop.permute.xlu0 %504 }
 0x375   :  { %v590_v54 = vpop.permute.xlu1 %589 }
 0x42a   :  { %v491_v34 = vpop.f32.mrf.mxu1 }
 0x42b   :  { %v492_v37 = vadd.f32 %v491_v34, %v420_v36 }
 0x42c   :  { %v493_v39 = vpop.f32.mrf.mxu1 }
 0x42d   :  { %v494_v40 = vadd.f32 %v493_v39, %v420_v36  ;;  %v496_v43 = vmax.f32 %v492_v37, 0.0 }
 0x42f   :  { %v497_v41 = vmax.f32 %v494_v40, 0.0 }
 0x431   :  { %540 = vmatprep.subr.mxu0 %v497_v41 }
 0x432   :  { %541 = vmatpush1.msra.mxu0 %v496_v43 }
 0x433   :  { %1340 = vmatmul.mubr.msk.f32.vlgmr.msra.gmra.mxu0 %vm292_vm11, %v1338_v44 }
 0x434   :  { %659 = vmatprep.mubr.f32.mxu0 %v1468_v1 }
 0x4f3   :  { %v576_v46 = vpop.f32.mrf.mxu0 }
 0x4f4   :  { %v577_v48 = vadd.f32 %v576_v46, %v505_v47 }
 0x4f5   :  { %v578_v49 = vpop.f32.mrf.mxu0 }
 0x4f6   :  { %v579_v50 = vadd.f32 %v578_v49, %v505_v47  ;;  %v581_v52 = vadd.f32 %v577_v48, %v1632_v63  ;;  %v1344_v47 = vld [vmem:[%s1825_s3 + $0x30] sm:$0xff]  ;;  %v713_v48 = vpop.permute.xlu0 %712 }
 0x4f8   :  { %v582_v51 = vadd.f32 %v579_v50, %v1636_v6 }
 0x4fa   :  { %625 = vmatprep.subr.mxu0 %v582_v51 }
 0x4fb   :  { %626 = vmatpush1.msra.mxu0 %v581_v52 }
 0x4fc   :  { %1343 = vmatmul.mubr.msk.f32.vlgmr.msra.gmra.mxu0 %vm292_vm11, %v1341_v53 }
 0x4fd   :  { %883 = vmatprep.mubr.f32.mxu0 %v1468_v1 }
 0x5bc   :  { %v661_v55 = vpop.f32.mrf.mxu0 }
 0x5bd   :  { %v662_v56 = vadd.f32 %v661_v55, %v590_v54  ;;  %v1348_v55 = vld [vmem:[%s1826_s4 + $0x38] sm:$0xff] }
 0x5be   :  { %v663_v57 = vpop.f32.mrf.mxu0 }
 0x5bf   :  { %666 = vst [vmem:[#allocation5] sm:$0xff] %v662_v56  ;;  %v670_v58 = vsel %vm42_vm12, %v662_v56, -1e+30  ;;  %v664_v59 = vadd.f32 %v663_v57, %v590_v54  ;;  %v1355_v56 = vld [vmem:[%s1826_s4 + $0x40] sm:$0xff] }
 0x5c0   :  { %v672_v60 = vrot.slane %v670_v58, 4 }
 0x5c1   :  { %667 = vst [vmem:[#allocation5 + $0x8] sm:$0xff] %v664_v59  ;;  %v671_v61 = vsel %vm42_vm12, %v664_v59, -1e+30 }
 0x5c2   :  { %v673_v62 = vmax.f32 %v670_v58, %v672_v60  ;;  %v678_v63 = vrot.slane %v671_v61, 4 }
 0x5c4   :  { %v674_v0 = vrot.slane %v673_v62, 2  ;;  %v679_v6 = vmax.f32 %v671_v61, %v678_v63 }
 0x5c6   :  { %v675_v7 = vmax.f32 %v673_v62, %v674_v0  ;;  %v680_v8 = vrot.slane %v679_v6, 2 }
 0x5c8   :  { %v676_v11 = vrot.slane %v675_v7, 1  ;;  %v681_v12 = vmax.f32 %v679_v6, %v680_v8  ;;  %v1347_v6 = vld [vmem:[%s1825_s3 + $0x38] sm:$0xff] }
 0x5ca   :  { %v677_v13 = vmax.f32 %v675_v7, %v676_v11  ;;  %v682_v14 = vrot.slane %v681_v12, 1 }
 0x5cc   :  { %v684_v2 = vsub.f32 %v670_v58, %v677_v13  ;;  %v683_v15 = vmax.f32 %v681_v12, %v682_v14  ;;  %v1354_v14 = vld [vmem:[%s1825_s3 + $0x40] sm:$0xff] }
 0x5ce   :  { %v686_v16 = vmul.f32 1.442695, %v684_v2  ;;  %v685_v17 = vsub.f32 %v671_v61, %v683_v15 }
 0x5d0   :  { %1383 = vpow2.f32 %v686_v16  ;;  %v688_v19 = vmul.f32 1.442695, %v685_v17 }
 0x5d2   :  { %1385 = vpow2.f32 %v688_v19 }
 0x5dd   :  { %v1384_v20 = vpop.eup %1383 }
 0x5de   :  { %v690_v22 = vrot.slane %v1384_v20, 4 }
 0x5df   :  { %v1386_v23 = vpop.eup %1385 }
 0x5e0   :  { %v696_v24 = vrot.slane %v1386_v23, 4  ;;  %v691_v26 = vadd.f32 %v1384_v20, %v690_v22 }
 0x5e2   :  { %v697_v27 = vadd.f32 %v1386_v23, %v696_v24  ;;  %v692_v31 = vrot.slane %v691_v26, 2  ;;  %v1365_v24 = vld [vmem:[%s1826_s4 + $0x50] sm:$0xff] }
 0x5e4   :  { %v698_v32 = vrot.slane %v697_v27, 2  ;;  %v693_v33 = vadd.f32 %v692_v31, %v691_v26  ;;  %v1368_v26 = vld [vmem:[%s1826_s4 + $0x58] sm:$0xff] }
 0x5e6   :  { %v699_v34 = vadd.f32 %v698_v32, %v697_v27  ;;  %v694_v36 = vrot.slane %v693_v33, 1 }
 0x5e8   :  { %v700_v37 = vrot.slane %v699_v34, 1  ;;  %v695_v39 = vadd.f32 %v694_v36, %v693_v33 }
 0x5ea   :  { %v701_v40 = vadd.f32 %v700_v37, %v699_v34  ;;  %1387 = vrcp.f32 %v695_v39 }
 0x5ec   :  { %1389 = vrcp.f32 %v701_v40  ;;  %v1357_v40 = vld [vmem:[%s1825_s3 + $0x48] sm:$0xff] }
 0x5f7   :  { %v1388_v41 = vpop.eup %1387 }
 0x5f8   :  { %v703_v46 = vmul.f32 %v1388_v41, %v1384_v20 }
 0x5f9   :  { %v1390_v43 = vpop.eup %1389 }
 0x5fa   :  { %v705_v44 = vmul.f32 %v1390_v43, %v1386_v23  ;;  %v1358_v23 = vld [vmem:[%s1826_s4 + $0x48] sm:$0xff] }
 0x5fc   :  { %748 = vmatprep.subr.mxu1 %v705_v44 }
 0x5fd   :  { %749 = vmatpush1.msra.mxu1 %v703_v46 }
 0x5fe   :  { %1346 = vmatmul.mubr.msk.f32.vlgmr.msra.gmra.mxu1 %vm292_vm11, %v1344_v47  ;;  %v1364_v47 = vld [vmem:[%s1825_s3 + $0x50] sm:$0xff] }
 0x5ff   :  { %968 = vmatprep.mubr.f32.mxu1 %v1468_v1 }
 0x6be   :  { %v784_v49 = vpop.f32.mrf.mxu1 }
 0x6bf   :  { %v785_v50 = vadd.f32 %v784_v49, %v713_v48 }
 0x6c0   :  { %v786_v51 = vpop.f32.mrf.mxu1 }
 0x6c1   :  { %v789_v52 = vmul.f32 %v785_v50, %v1533_v9  ;;  %v787_v53 = vadd.f32 %v786_v51, %v713_v48 }
 0x6c3   :  { %v790_v54 = vmul.f32 %v787_v53, %v1536_v10  ;;  %799 = vrot.lane.b32.xlu1 %v789_v52, %s1470_s8  ;;  %v1367_v53 = vld [vmem:[%s1825_s3 + $0x58] sm:$0xff]  ;;  %s1474_s3 = smov [#allocation5]  }
 0x6c4   :  { %s1292_s7 = sshll.u32 %s1474_s3, 4  ;;  %s1293_s7 = int_to_ptr.vmem [resolvable:$true] %s1292_s7 }
 0x6c5   :  { %801 = vrot.lane.b32.xlu0 %v790_v54, %s1470_s8  ;;  %s1419_s10 = scalar_lea.vmem %s1293_s7, 512  ;;  %p1424_p6 = scmp.lt.s32.totalorder %s1293_s7, %s1293_s7 }
 0x6c6   :  { %p1420_p5 = scmp.ne.s32.totalorder %s1293_s7, %s1419_s10  ;;  %p1425_p7 = scmp.lt.s32.totalorder %s1419_s10, %s1419_s10 }
 0x6c7   :  { %791 = vrot.lane.b32.xlu1 %v789_v52, %s1471_s9 }
 0x6c8   :  { %p1426_p8 = por %p1425_p7, %p1424_p6 }
 0x6c9   :  { %793 = vrot.lane.b32.xlu0 %v790_v54, %s1471_s9 }
 0x6ca   :  { %p1427_p9 = pnand %p1426_p8, %p1420_p5 }
 0x6cb   :  { %813 = vperm.xlu1 %1382, %v1348_v55  }
 0x6cd   :  { %898 = vperm.xlu0 %1381, %v1355_v56  }
 0x735   :  { %v800_v57 = vpop.permute.xlu1 %799 }
 0x737   :  { %v802_v58 = vpop.permute.xlu0 %801 }
 0x738   :  { %v803_v59 = vsel %vm181_vm4, %v800_v57, %v802_v58  ;;  %v804_v60 = vsel %vm181_vm4, %v802_v58, %v800_v57  ;;  %vm1251_vm4 = vcmp.lt.s32.totalorder %v1572_v28, 16 }
 0x739   :  { %1349 = vmatprep.subr.msk.mxu0 %vm1583_vm5, %v804_v60  ;;  %v792_v61 = vpop.permute.xlu1 %791 }
 0x73a   :  { %1350 = vmatpush1.msk.msra.mxu0 %vm1588_vm6, %v803_v59 }
 0x73b   :  { %v794_v62 = vpop.permute.xlu0 %793  ;;  %847 = vmatprep.subr.mxu0 %v790_v54 }
 0x73c   :  { %v795_v63 = vsel %vm160_vm7, %v792_v61, %v794_v62  ;;  %v796_v0 = vsel %vm160_vm7, %v794_v62, %v792_v61  ;;  %848 = vmatpush1.msra.mxu0 %v789_v52 }
 0x73d   :  { %1351 = vmatprep.subr.msk.mxu0 %vm1602_vm8, %v795_v63 }
 0x73e   :  { %1352 = vmatpush1.msk.msra.mxu0 %vm1607_vm9, %v796_v0 }
 0x73f   :  { %1353 = vmatmul.mubr.msk.f32.vlgmr.msra.gmra.mxu0 %vm206_vm10, %v1347_v6 }
 0x740   :  { %1156 = vmatprep.mubr.f32.mxu0 %v1468_v1 }
 0x746   :  { %v814_v38 = vpop.permute.xlu1 %813 }
 0x748   :  { %v899_v42 = vpop.permute.xlu0 %898 }
 0x7ff   :  { %v885_v35 = vpop.f32.mrf.mxu0 }
 0x800   :  { %v886_v7 = vadd.f32 %v885_v35, %v814_v38 }
 0x801   :  { %v887_v8 = vpop.f32.mrf.mxu0 }
 0x802   :  { %v888_v11 = vadd.f32 %v887_v8, %v814_v38  ;;  %v890_v13 = vmax.f32 %v886_v7, 0.0 }
 0x804   :  { %v891_v12 = vmax.f32 %v888_v11, 0.0 }
 0x806   :  { %934 = vmatprep.subr.mxu1 %v891_v12 }
 0x807   :  { %935 = vmatpush1.msra.mxu1 %v890_v13 }
 0x808   :  { %1356 = vmatmul.mubr.msk.f32.vlgmr.msra.gmra.mxu1 %vm292_vm11, %v1354_v14 }
 0x809   :  { %1071 = vmatprep.mubr.f32.mxu1 %v1468_v1 }
 0x8c8   :  { %v970_v45 = vpop.f32.mrf.mxu1 }
 0x8c9   :  { %v971_v2 = vadd.f32 %v970_v45, %v899_v42 }
 0x8ca   :  { %v972_v15 = vpop.f32.mrf.mxu1 }
 0x8cb   :  { %v975_v16 = vadd.f32 %v971_v2, %v789_v52  ;;  %v973_v17 = vadd.f32 %v972_v15, %v899_v42 }
 0x8cd   :  { %v977_v19 = vmul.f32 %v975_v16, %v1533_v9  ;;  %v976_v20 = vadd.f32 %v973_v17, %v790_v54  ;;  %v1254_v54 = vsel %vm1251_vm4, 1, %v1469_v3 }
 0x8ce   :  { %v1262_v57 = vrot.slane %v1254_v54, %v1527_v5 }
 0x8cf   :  { %v978_v22 = vmul.f32 %v976_v20, %v1536_v10  ;;  %987 = vrot.lane.b32.xlu1 %v977_v19, %s1472_s19 }
 0x8d0   :  { %vm1264_vm6 = vcmp.eq.s32.totalorder %v1262_v57, 1 }
 0x8d1   :  { %989 = vrot.lane.b32.xlu0 %v978_v22, %s1472_s19 }
 0x8d3   :  { %979 = vrot.lane.b32.xlu1 %v977_v19, %s1473_s20 }
 0x8d5   :  { %981 = vrot.lane.b32.xlu0 %v978_v22, %s1473_s20 }
 0x8d7   :  { %1001 = vperm.xlu1 %1382, %v1358_v23  }
 0x8d9   :  { %1086 = vperm.xlu0 %1381, %v1365_v24  }
 0x8db   :  { %1171 = vperm.xlu1 %1382, %v1368_v26  }
 0x941   :  { %v988_v27 = vpop.permute.xlu1 %987 }
 0x943   :  { %v990_v31 = vpop.permute.xlu0 %989 }
 0x944   :  { %v991_v32 = vsel %vm397_vm14, %v988_v27, %v990_v31  ;;  %v992_v33 = vsel %vm397_vm14, %v990_v31, %v988_v27 }
 0x945   :  { %1359 = vmatprep.subr.msk.mxu1 %vm1665_vm15, %v992_v33  ;;  %v980_v34 = vpop.permute.xlu1 %979 }
 0x946   :  { %1360 = vmatpush1.msk.msra.mxu1 %vm1670_vm0, %v991_v32 }
 0x947   :  { %v982_v36 = vpop.permute.xlu0 %981  ;;  %1035 = vmatprep.subr.mxu1 %v978_v22 }
 0x948   :  { %v983_v37 = vsel %vm376_vm1, %v980_v34, %v982_v36  ;;  %v984_v39 = vsel %vm376_vm1, %v982_v36, %v980_v34  ;;  %1036 = vmatpush1.msra.mxu1 %v977_v19 }
 0x949   :  { %1361 = vmatprep.subr.msk.mxu1 %vm1684_vm2, %v983_v37 }
 0x94a   :  { %1362 = vmatpush1.msk.msra.mxu1 %vm1689_vm3, %v984_v39 }
 0x94b   :  { %1363 = vmatmul.mubr.msk.f32.vlgmr.msra.gmra.mxu1 %vm206_vm10, %v1357_v40 }
 0x952   :  { %v1002_v21 = vpop.permute.xlu1 %1001 }
 0x954   :  { %v1087_v29 = vpop.permute.xlu0 %1086 }
 0x956   :  { %v1172_v55 = vpop.permute.xlu1 %1171 }
 0xa0b   :  { %v1073_v18 = vpop.f32.mrf.mxu1 }
 0xa0c   :  { %v1074_v41 = vadd.f32 %v1073_v18, %v1002_v21 }
 0xa0d   :  { %v1075_v43 = vpop.f32.mrf.mxu1 }
 0xa0e   :  { %v1076_v44 = vadd.f32 %v1075_v43, %v1002_v21  ;;  %v1078_v46 = vmax.f32 %v1074_v41, 0.0 }
 0xa10   :  { %v1079_v30 = vmax.f32 %v1076_v44, 0.0 }
 0xa12   :  { %1122 = vmatprep.subr.mxu0 %v1079_v30 }
 0xa13   :  { %1123 = vmatpush1.msra.mxu0 %v1078_v46 }
 0xa14   :  { %1366 = vmatmul.mubr.msk.f32.vlgmr.msra.gmra.mxu0 %vm292_vm11, %v1364_v47 }
 0xa15   :  { %1241 = vmatprep.mubr.f32.mxu0 %v1468_v1  ;;  %v1258_v1 = vrot.slane %v1254_v54, %v1524_v4 }
 0xa17   :  { %vm1263_vm5 = vcmp.eq.s32.totalorder %v1258_v1, 1 }
 0xad4   :  { %v1158_v25 = vpop.f32.mrf.mxu0 }
 0xad5   :  { %v1159_v48 = vadd.f32 %v1158_v25, %v1087_v29 }
 0xad6   :  { %v1160_v49 = vpop.f32.mrf.mxu0 }
 0xad7   :  { %v1161_v50 = vadd.f32 %v1160_v49, %v1087_v29  ;;  %v1163_v52 = vadd.f32 %v1159_v48, %v977_v19 }
 0xad9   :  { %v1164_v51 = vadd.f32 %v1161_v50, %v978_v22 }
 0xadb   :  { %1207 = vmatprep.subr.mxu0 %v1164_v51 }
 0xadc   :  { %1208 = vmatpush1.msra.mxu0 %v1163_v52 }
 0xadd   :  { %1369 = vmatmul.mubr.msk.f32.vlgmr.msra.gmra.mxu0 %vm292_vm11, %v1367_v53 }
 0xb9d   :  { %v1243_v56 = vpop.f32.mrf.mxu0 }
 0xb9e   :  { %v1244_v58 = vadd.f32 %v1243_v56, %v1172_v55 }
 0xb9f   :  { %v1245_v59 = vpop.f32.mrf.mxu0 }
 0xba0   :  { %1249 = vst [vmem:[#allocation5 + $0x10] sm:$0xff] %v1244_v58  ;;  %v1246_v60 = vadd.f32 %v1245_v59, %v1172_v55  ;;  %v1252_v61 = vmul.f32 %v1244_v58, %v1533_v9 }
 0xba2   :  { %1250 = vst [vmem:[#allocation5 + $0x18] sm:$0xff] %v1246_v60  ;;  %v1265_v62 = vsel %vm1263_vm5, %v1252_v61, -1e+30  ;;  %v1253_v28 = vmul.f32 %v1246_v60, %v1536_v10 }
 0xba3   :  { %1267 = vmax.xlane.f32.xlu0 %v1265_v62 }
 0xba4   :  { %v1266_v3 = vsel %vm1264_vm6, %v1253_v28, -1e+30 }
 0xba5   :  { %1277 = vmax.xlane.f32.xlu1 %v1266_v3 }
 0xc2c   :  { %v1268_v4 = vpop.xlane.xlu0 %1267 }
 0xc2d   :  { %v1269_v63 = vsub.f32 %v1265_v62, %v1268_v4 }
 0xc2e   :  { %v1278_v0 = vpop.xlane.xlu1 %1277 }
 0xc2f   :  { %v1270_v6 = vmul.f32 1.442695, %v1269_v63  ;;  %v1279_v5 = vsub.f32 %v1266_v3, %v1278_v0 }
 0xc31   :  { %1391 = vpow2.f32 %v1270_v6  ;;  %v1280_v35 = vmul.f32 1.442695, %v1279_v5 }
 0xc33   :  { %1393 = vpow2.f32 %v1280_v35 }
 0xc3e   :  { %v1392_v38 = vpop.eup %1391 }
 0xc3f   :  { %1272 = vadd.xlane.f32.xlu0 %v1392_v38 }
 0xc40   :  { %v1394_v7 = vpop.eup %1393 }
 0xc43   :  { %1282 = vadd.xlane.f32.xlu0 %v1394_v7 }
 0xc44   :  { %1430 = shalt.err (!%p1427_p9)
}
 0xc45   :  { %1298 = dma.vmem_to_hbm [thread:$0]  %s1293_s7, 512, %s1827_s5, [#allocation4], %s1466_s24, %s1466_s24, %s1467_s25  }
 0xc46   :  { %s1475_s13 = smov [#allocation6]  }
 0xc47   :  { %s1305_s14 = sshll.u32 %s1475_s13, 4  ;;  %s1306_s14 = int_to_ptr.vmem [resolvable:$true] %s1305_s14 }
 0xc48   :  { %s1439_s15 = scalar_lea.vmem %s1306_s14, 256  ;;  %p1444_p11 = scmp.lt.s32.totalorder %s1306_s14, %s1306_s14 }
 0xc49   :  { %p1440_p10 = scmp.ne.s32.totalorder %s1306_s14, %s1439_s15  ;;  %p1445_p12 = scmp.lt.s32.totalorder %s1439_s15, %s1439_s15 }
 0xc4b   :  { %p1446_p13 = por %p1445_p12, %p1444_p11 }
 0xc4d   :  { %p1447_p0 = pnand %p1446_p13, %p1440_p10 }
 0xcc8   :  { %v1273_v9 = vpop.xlane.xlu0 %1272 }
 0xcc9   :  { %1395 = vrcp.f32 %v1273_v9 }
 0xccc   :  { %v1283_v10 = vpop.xlane.xlu0 %1282 }
 0xccd   :  { %1397 = vrcp.f32 %v1283_v10 }
 0xcd6   :  { %v1396_v8 = vpop.eup %1395 }
 0xcd7   :  { %v1275_v11 = vmul.f32 %v1396_v8, %v1392_v38 }
 0xcd9   :  { %1276 = vst [vmem:[#allocation6] sm:$0xff] %v1275_v11 }
 0xcda   :  { %v1398_v12 = vpop.eup %1397 }
 0xcdb   :  { %v1285_v13 = vmul.f32 %v1398_v12, %v1394_v7 }
 0xcdd   :  { %1286 = vst [vmem:[#allocation6 + $0x8] sm:$0xff] %v1285_v13 }
 0xcde   :  { %1450 = shalt.err (!%p1447_p0)
}
 0xcdf   :  { %1308 = dma.vmem_to_hbm [thread:$0]  %s1306_s14, 256, %s1828_s6, [#allocation7]  }
 0xce0   :  { %1461 = dma.done.wait [#allocation4], 512  }
 0xce1   :  { %1462 = vsyncadd [#allocation4], 4294966784 }
 0xce2   :  { %1463 = dma.done.wait [#allocation7], 256  }
 0xce3   :  { %1464 = vsyncadd [#allocation7], 4294967040 }
 0xce4   :  { %1315 = vsyncpa [#allocation3], 1 }
 0xce5   :  { %1316 = vsyncpa [#allocation4], 1 }
 0xce6   :  { %1317 = vsyncpa [#allocation7], 1 }

</bundles_post_ra>
